<compile_context>
chip_gen: v7x
topology: tpu7x:2x2x1
jax: 0.10.0
libtpu: 0.0.40
codegen_flags: <defaults>
</compile_context>

<pallas_src>
import functools

import jax
import jax.numpy as jnp
from jax import lax
from jax.experimental import pallas as pl
from jax.experimental.pallas import tpu as pltpu


# ---------------------------------------------------------------------------
# Shared flash-attention step / finalize helpers.
# ---------------------------------------------------------------------------

def _flash_update(xq, xk, k_start, n_valid, mask_keys, matmul_dtype, cast_p,
                  m_sc, l_sc, acc_sc):
    """One online-softmax update with a (tk, tq) energy tile (keys on sublanes)."""
    if matmul_dtype is None:
        xq_mm, xk_mm = xq, xk
    else:
        xq_mm = xq.astype(matmul_dtype)
        xk_mm = xk.astype(matmul_dtype)

    # energy_t[j, i] = sum_c x[c, kj] * x[c, qi] -> (tk, tq); contraction over
    # C expressed via dimension_numbers so the MXU consumes operands natively.
    energy_t = lax.dot_general(
        xk_mm, xq_mm, (((0,), (0,)), ((), ())),
        preferred_element_type=jnp.float32)                 # (tk, tq) f32

    if mask_keys:
        tk, tq = energy_t.shape
        kidx = lax.broadcasted_iota(jnp.int32, (tk, tq), 0) + k_start
        energy_t = jnp.where(kidx < n_valid, energy_t, -jnp.inf)

    m_prev = m_sc[...]                                      # (1, tq)
    m_new = jnp.maximum(m_prev, jnp.max(energy_t, axis=0, keepdims=True))
    alpha = jnp.exp(m_prev - m_new)                         # (1, tq)
    p = jnp.exp(energy_t - m_new)                           # (tk, tq) f32

    l_sc[...] = alpha * l_sc[...] + jnp.sum(p, axis=0, keepdims=True)

    # On v5e, cast_p=False avoids the VALU cost of casting the (tk, tq) tile
    # (its VPU has no bf16); the second matmul then runs in f32.
    p_mm = p.astype(matmul_dtype) if (matmul_dtype is not None and cast_p) else p
    # out[c, qi] += sum_j x[c, kj] * p[kj, qi] -> plain (C, tk) @ (tk, tq).
    acc_sc[...] = alpha * acc_sc[...] + jnp.dot(
        xk_mm, p_mm, preferred_element_type=jnp.float32)
    m_sc[...] = m_new


def _finalize(gamma_ref, xq, out_ref, l_sc, acc_sc):
    gamma = gamma_ref[0, 0]
    inv_l = pl.reciprocal(l_sc[...], approx=True)           # EUP slot
    out_ref[...] = (gamma * (acc_sc[...] * inv_l) + xq).astype(out_ref.dtype)


# ---------------------------------------------------------------------------
# Kernel bodies.
# ---------------------------------------------------------------------------

def pam_kernel_resident(gamma_ref, x_ref, out_ref, m_sc, l_sc, acc_sc, *,
                        tq, tk, n_valid, mask_keys, matmul_dtype, cast_p):
    # x_ref: (C, N_pad) per-batch slab, resident in VMEM across (qi, ki).
    qi = pl.program_id(1)
    ki = pl.program_id(2)

    @pl.when(ki == 0)
    def _init():
        m_sc[...] = jnp.full_like(m_sc, -jnp.inf)
        l_sc[...] = jnp.zeros_like(l_sc)
        acc_sc[...] = jnp.zeros_like(acc_sc)

    q_start = pl.multiple_of(qi * tq, 128)
    k_start = pl.multiple_of(ki * tk, 128)
    xq = x_ref[:, pl.ds(q_start, tq)]                       # (C, tq)
    xk = x_ref[:, pl.ds(k_start, tk)]                       # (C, tk)

    _flash_update(xq, xk, ki * tk, n_valid, mask_keys, matmul_dtype, cast_p,
                  m_sc, l_sc, acc_sc)

    @pl.when(ki == pl.num_programs(2) - 1)
    def _fin():
        _finalize(gamma_ref, xq, out_ref, l_sc, acc_sc)


def pam_kernel_tiled(gamma_ref, xq_ref, xk_ref, out_ref, m_sc, l_sc, acc_sc, *,
                     tk, n_valid, mask_keys, matmul_dtype, cast_p):
    ki = pl.program_id(2)

    @pl.when(ki == 0)
    def _init():
        m_sc[...] = jnp.full_like(m_sc, -jnp.inf)
        l_sc[...] = jnp.zeros_like(l_sc)
        acc_sc[...] = jnp.zeros_like(acc_sc)

    xq = xq_ref[...]                                        # (C, tq)
    xk = xk_ref[...]                                        # (C, tk)
    _flash_update(xq, xk, ki * tk, n_valid, mask_keys, matmul_dtype, cast_p,
                  m_sc, l_sc, acc_sc)

    @pl.when(ki == pl.num_programs(2) - 1)
    def _fin():
        _finalize(gamma_ref, xq, out_ref, l_sc, acc_sc)


# ---------------------------------------------------------------------------
# Wrapper.
# ---------------------------------------------------------------------------

def _vmem_budget_bytes():
    """Per-generation VMEM budget: ~75% of physical capacity, capped at 100 MiB.
    (v5e/v6e: 128 MiB -> 96 MiB;  v7x: 64 MiB -> 48 MiB; fallback 48 MiB)."""
    cap = 64 * 1024 * 1024
    try:
        cap = int(pltpu.get_tpu_info().vmem_capacity_bytes)
    except Exception:
        pass
    return min((cap * 3) // 4, 100 * 1024 * 1024)


def _pick_tile(n_pad, preferred):
    """Largest 128-multiple <= preferred that divides n_pad (n_pad % 128 == 0)."""
    t = max(128, (min(preferred, n_pad) // 128) * 128)
    while n_pad % t != 0:
        t -= 128
    return t


def pam_forward(x, gamma, *, block_q=1024, block_k=512,
                matmul_dtype=jnp.bfloat16, cast_p=True,
                force_tiled=False, vmem_budget_bytes=None):
    """PAM forward. x: (B, C, H, W) float32, gamma: scalar. Returns (B, C, H, W)."""
    B, C, H, W = x.shape
    N = H * W
    N_pad = ((N + 127) // 128) * 128
    mask_keys = N_pad != N

    xf = x.reshape(B, C, N)
    if mask_keys:
        xf = jnp.pad(xf, ((0, 0), (0, 0), (0, N_pad - N)))
    gamma_arr = jnp.asarray(gamma, jnp.float32).reshape(1, 1)

    itemsize = xf.dtype.itemsize
    budget = int(vmem_budget_bytes) if vmem_budget_bytes else _vmem_budget_bytes()

    # --- tile selection ------------------------------------------------------
    tq = _pick_tile(N_pad, block_q)
    # Keep >= 2 parallel grid blocks so both v7x TensorCores get work.
    while B * (N_pad // tq) < 2 and tq > 128:
        tq = _pick_tile(N_pad, tq // 2)
    tk = _pick_tile(N_pad, block_k)

    def vmem_use(tq_, tk_, resident_):
        scratch = C * tq_ * 4 + 2 * 8 * tq_ * 4            # acc + m/l (8-sublane pad)
        temps = 4 * tk_ * tq_ * 4                          # energy / p (+ casts)
        out = 2 * C * tq_ * itemsize                       # double-buffered out
        if resident_:
            ins = 2 * C * N_pad * itemsize                 # resident slab (x2 buf)
        else:
            ins = 2 * C * (tq_ + tk_) * itemsize           # xq + xk tiles (x2 buf)
        return ins + out + scratch + temps

    resident = (not force_tiled) and vmem_use(tq, tk, True) <= int(0.8 * budget)
    if not resident:
        # Shrink tiles until the streamed working set fits the budget.
        while vmem_use(tq, tk, False) > int(0.8 * budget) and (tq > 128 or tk > 128):
            if tk >= tq and tk > 128:
                tk = _pick_tile(N_pad, tk // 2)
            elif tq > 128:
                tq = _pick_tile(N_pad, tq // 2)
            else:
                break

    grid = (B, N_pad // tq, N_pad // tk)

    # --- specs / kernel / cost ------------------------------------------------
    gamma_spec = pl.BlockSpec(memory_space=pltpu.MemorySpace.SMEM)
    out_spec = pl.BlockSpec((pl.Squeezed(), C, tq), lambda b, qi, ki: (b, 0, qi))

    if resident:
        kernel = functools.partial(
            pam_kernel_resident, tq=tq, tk=tk, n_valid=N, mask_keys=mask_keys,
            matmul_dtype=matmul_dtype, cast_p=cast_p)
        in_specs = [
            gamma_spec,
            # Whole per-batch slab stays resident in VMEM across (qi, ki): x is
            # read from HBM exactly once per batch element.
            pl.BlockSpec((pl.Squeezed(), C, N_pad), lambda b, qi, ki: (b, 0, 0)),
        ]
        operands = (gamma_arr, xf)
        bytes_accessed = 2 * B * C * N_pad * itemsize      # slab read + out write
    else:
        kernel = functools.partial(
            pam_kernel_tiled, tk=tk, n_valid=N, mask_keys=mask_keys,
            matmul_dtype=matmul_dtype, cast_p=cast_p)
        in_specs = [
            gamma_spec,
            pl.BlockSpec((pl.Squeezed(), C, tq), lambda b, qi, ki: (b, 0, qi)),
            pl.BlockSpec((pl.Squeezed(), C, tk), lambda b, qi, ki: (b, 0, ki)),
        ]
        operands = (gamma_arr, xf, xf)
        # key tiles re-read once per query block + query tiles + output write.
        bytes_accessed = B * C * N_pad * itemsize * (2 + N_pad // tq)

    cost = pl.CostEstimate(
        flops=int(4 * B * C * N_pad * N_pad),              # two N x N x C matmuls
        transcendentals=int(B * N_pad * N_pad),            # softmax exp
        bytes_accessed=int(bytes_accessed),
    )

    out = pl.pallas_call(
        kernel,
        out_shape=jax.ShapeDtypeStruct((B, C, N_pad), x.dtype),
        grid=grid,
        in_specs=in_specs,
        out_specs=out_spec,
        scratch_shapes=[
            pltpu.VMEM((1, tq), jnp.float32),   # running max
            pltpu.VMEM((1, tq), jnp.float32),   # running denominator
            pltpu.VMEM((C, tq), jnp.float32),   # unnormalized output accumulator
        ],
        compiler_params=pltpu.CompilerParams(
            dimension_semantics=("parallel", "parallel", "arbitrary"),
            vmem_limit_bytes=budget,
        ),
        cost_estimate=cost,
    )(*operands)

    if mask_keys:
        out = out[:, :, :N]
    return out.reshape(B, C, H, W)


# ---------------------------------------------------------------------------
# Pure-JAX reference + parameter init (mirrors PAM_Module.__init__ shapes).
# ---------------------------------------------------------------------------

def pam_reference(x, gamma):
    """Pure-JAX reference mirroring the PyTorch forward exactly."""
    B, C, H, W = x.shape
    N = H * W
    xf = x.reshape(B, C, N)
    proj_query = jnp.transpose(xf, (0, 2, 1))               # (B, N, C)
    proj_key = xf                                           # (B, C, N)
    energy = jnp.einsum("bnc,bcm->bnm", proj_query, proj_key)
    attention = jax.nn.softmax(energy, axis=-1)             # (B, N, N)
    proj_value = xf                                         # (B, C, N)
    out = jnp.einsum("bcn,bmn->bcm", proj_value, attention)
    out = out.reshape(B, C, H, W)
    return gamma * out + x


def init_pam_params(key, in_dim):
    """Deterministic parameter init matching PAM_Module.__init__ shapes."""
    kq, kk, kv = jax.random.split(key, 3)
    return {
        # 1x1 conv weights/biases — declared by the module but unused in forward().
        "query_conv_w": jax.random.normal(kq, (in_dim // 8, in_dim, 1, 1), jnp.float32) * 0.02,
        "query_conv_b": jnp.zeros((in_dim // 8,), jnp.float32),
        "key_conv_w": jax.random.normal(kk, (in_dim // 8, in_dim, 1, 1), jnp.float32) * 0.02,
        "key_conv_b": jnp.zeros((in_dim // 8,), jnp.float32),
        "value_conv_w": jax.random.normal(kv, (in_dim, in_dim, 1, 1), jnp.float32) * 0.02,
        "value_conv_b": jnp.zeros((in_dim,), jnp.float32),
        # gamma initialized to zero, exactly like nn.Parameter(torch.zeros(1)).
        "gamma": jnp.zeros((1,), jnp.float32),
    }


if __name__ == "__main__":
    key = jax.random.PRNGKey(0)
    kx, kx2, kp = jax.random.split(key, 3)

    # Small shapes consistent with the module (in_dim // 8 >= 1): B=2, C=8, 16x16.
    B, C, H, W = 2, 8, 16, 16
    x = jax.random.normal(kx, (B, C, H, W), jnp.float32)
    params = init_pam_params(kp, C)

    # 1) Fresh-module fidelity: gamma = 0 -> out == x exactly (resident + bf16 path).
    out0 = jax.block_until_ready(pam_forward(x, params["gamma"][0]))
    assert jnp.allclose(out0, x, atol=1e-6, rtol=1e-6)

    gamma = jnp.float32(0.5)
    ref = pam_reference(x, gamma)

    # 2) Resident slab, multi-tile flash sweep (2x2 tiles over N=256), f32 MXU.
    out1 = jax.block_until_ready(
        pam_forward(x, gamma, block_q=128, block_k=128, matmul_dtype=None))
    assert jnp.allclose(out1, ref, atol=2e-3, rtol=2e-3)

    # 3) Tiled fallback path (key tiles streamed via BlockSpec), f32 MXU.
    out2 = jax.block_until_ready(
        pam_forward(x, gamma, block_q=128, block_k=128, matmul_dtype=None,
                    force_tiled=True))
    assert jnp.allclose(out2, ref, atol=2e-3, rtol=2e-3)

    # 4) Default fast path: bf16 MXU operands, large tiles, resident slab.
    out3 = jax.block_until_ready(pam_forward(x, gamma))
    assert jnp.allclose(out3, ref, atol=1e-1, rtol=1e-1)

    # 5) Non-128-multiple spatial size: pad to 128 + in-kernel key masking.
    Hb = Wb = 15                            # N = 225 -> padded to 256
    xb = jax.random.normal(kx2, (1, C, Hb, Wb), jnp.float32)
    refb = pam_reference(xb, gamma)
    outb = jax.block_until_ready(pam_forward(xb, gamma, matmul_dtype=None))
    assert jnp.allclose(outb, refb, atol=2e-3, rtol=2e-3)

    print("KERNEL_OK")
</pallas_src>

<mosaic_0001>
module attributes {stable_mosaic.version = 11 : i64} {
  func.func @pam_kernel_resident(%arg0: i32, %arg1: i32, %arg2: i32, %arg3: memref<1x1xf32, #tpu.memory_space<smem>>, %arg4: memref<1x8x256xf32, #tpu.memory_space<vmem>>, %arg5: memref<1x8x256xf32, #tpu.memory_space<vmem>>, %arg6: memref<1x256xf32, #tpu.memory_space<vmem>>, %arg7: memref<1x256xf32, #tpu.memory_space<vmem>>, %arg8: memref<8x256xf32, #tpu.memory_space<vmem>>) attributes {dimension_semantics = [#tpu.dimension_semantics<parallel>, #tpu.dimension_semantics<parallel>, #tpu.dimension_semantics<arbitrary>], iteration_bounds = array<i64: 2, 1, 1>, scalar_prefetch = 0 : i64, scratch_operands = 3 : i64, tpu.core_type = #tpu.core_type<tc>, window_params = [{transform_indices = @transform_0, window_bounds = array<i64: 1, 1>}, {transform_indices = @transform_1, window_bounds = array<i64: 1, 8, 256>}, {transform_indices = @transform_2, window_bounds = array<i64: 1, 8, 256>}]} {
    %c0_i32 = arith.constant 0 : i32
    %0 = arith.cmpi eq, %arg2, %c0_i32 : i32
    %1 = arith.extui %0 : i1 to i32
    %c0_i32_0 = arith.constant 0 : i32
    %2 = arith.cmpi ne, %1, %c0_i32_0 : i32
    scf.if %2 {
      %cst_22 = arith.constant 0xFF800000 : f32
      %42 = vector.broadcast %cst_22 : f32 to vector<1x256xf32>
      %c0_23 = arith.constant 0 : index
      %c0_24 = arith.constant 0 : index
      %43 = vector.load %arg6[%c0_23, %c0_24] : memref<1x256xf32, #tpu.memory_space<vmem>>, vector<1x256xf32>
      tpu.vector_store %arg6[%c0_23, %c0_24], %42 {strides = array<i32>} : memref<1x256xf32, #tpu.memory_space<vmem>>, vector<1x256xf32>,
      %cst_25 = arith.constant 0.000000e+00 : f32
      %44 = vector.broadcast %cst_25 : f32 to vector<1x256xf32>
      %c0_26 = arith.constant 0 : index
      %c0_27 = arith.constant 0 : index
      %45 = vector.load %arg7[%c0_26, %c0_27] : memref<1x256xf32, #tpu.memory_space<vmem>>, vector<1x256xf32>
      tpu.vector_store %arg7[%c0_26, %c0_27], %44 {strides = array<i32>} : memref<1x256xf32, #tpu.memory_space<vmem>>, vector<1x256xf32>,
      %cst_28 = arith.constant 0.000000e+00 : f32
      %46 = vector.broadcast %cst_28 : f32 to vector<8x256xf32>
      %c0_29 = arith.constant 0 : index
      %c0_30 = arith.constant 0 : index
      %47 = vector.load %arg8[%c0_29, %c0_30] : memref<8x256xf32, #tpu.memory_space<vmem>>, vector<8x256xf32>
      tpu.vector_store %arg8[%c0_29, %c0_30], %46 {strides = array<i32>} : memref<8x256xf32, #tpu.memory_space<vmem>>, vector<8x256xf32>,
    } else {
    }
    %c256_i32 = arith.constant 256 : i32
    %3 = arith.muli %arg1, %c256_i32 : i32
    %4 = tpu.assume_multiple %3, 128 : i32
    %c256_i32_1 = arith.constant 256 : i32
    %5 = arith.muli %arg2, %c256_i32_1 : i32
    %6 = tpu.assume_multiple %5, 128 : i32
    %c0 = arith.constant 0 : index
    %c0_2 = arith.constant 0 : index
    %7 = arith.index_cast %4 : i32 to index
    %8 = vector.load %arg4[%c0, %c0_2, %7] : memref<1x8x256xf32, #tpu.memory_space<vmem>>, vector<1x8x256xf32>
    %9 = vector.shape_cast %8 : vector<1x8x256xf32> to vector<8x256xf32>
    %c0_3 = arith.constant 0 : index
    %c0_4 = arith.constant 0 : index
    %10 = arith.index_cast %6 : i32 to index
    %11 = vector.load %arg4[%c0_3, %c0_4, %10] : memref<1x8x256xf32, #tpu.memory_space<vmem>>, vector<1x8x256xf32>
    %12 = vector.shape_cast %11 : vector<1x8x256xf32> to vector<8x256xf32>
    %13 = arith.truncf %9 : vector<8x256xf32> to vector<8x256xbf16>
    %14 = arith.truncf %12 : vector<8x256xf32> to vector<8x256xbf16>
    %cst = arith.constant dense<0.000000e+00> : vector<256x256xf32>
    %15 = tpu.matmul %14, %13, %cst {dimension_numbers = #tpu.dot_dimension_numbers<[0], [0], [1], [1], [0, 1, 1, 1], [], []>} : vector<8x256xbf16>, vector<8x256xbf16>, vector<256x256xf32> -> vector<256x256xf32>
    %c0_5 = arith.constant 0 : index
    %c0_6 = arith.constant 0 : index
    %16 = vector.load %arg6[%c0_5, %c0_6] : memref<1x256xf32, #tpu.memory_space<vmem>>, vector<1x256xf32>
    %cst_7 = arith.constant dense<0xFF800000> : vector<256xf32>
    %17 = vector.multi_reduction <maximumf>, %15, %cst_7 [0] : vector<256x256xf32> to vector<256xf32>
    %18 = vector.shape_cast %17 : vector<256xf32> to vector<1x256xf32>
    %19 = arith.maximumf %16, %18 : vector<1x256xf32>
    %20 = arith.subf %16, %19 : vector<1x256xf32>
    %21 = math.exp %20 : vector<1x256xf32>
    %22 = vector.broadcast %19 : vector<1x256xf32> to vector<256x256xf32>
    %23 = arith.subf %15, %22 : vector<256x256xf32>
    %24 = math.exp %23 : vector<256x256xf32>
    %c0_8 = arith.constant 0 : index
    %c0_9 = arith.constant 0 : index
    %25 = vector.load %arg7[%c0_8, %c0_9] : memref<1x256xf32, #tpu.memory_space<vmem>>, vector<1x256xf32>
    %26 = arith.mulf %21, %25 : vector<1x256xf32>
    %cst_10 = arith.constant dense<0.000000e+00> : vector<256xf32>
    %27 = vector.multi_reduction <add>, %24, %cst_10 [0] : vector<256x256xf32> to vector<256xf32>
    %28 = vector.shape_cast %27 : vector<256xf32> to vector<1x256xf32>
    %29 = arith.addf %26, %28 : vector<1x256xf32>
    %c0_11 = arith.constant 0 : index
    %c0_12 = arith.constant 0 : index
    %30 = vector.load %arg7[%c0_11, %c0_12] : memref<1x256xf32, #tpu.memory_space<vmem>>, vector<1x256xf32>
    tpu.vector_store %arg7[%c0_11, %c0_12], %29 {strides = array<i32>} : memref<1x256xf32, #tpu.memory_space<vmem>>, vector<1x256xf32>,
    %31 = arith.truncf %24 : vector<256x256xf32> to vector<256x256xbf16>
    %c0_13 = arith.constant 0 : index
    %c0_14 = arith.constant 0 : index
    %32 = vector.load %arg8[%c0_13, %c0_14] : memref<8x256xf32, #tpu.memory_space<vmem>>, vector<8x256xf32>
    %33 = vector.broadcast %21 : vector<1x256xf32> to vector<8x256xf32>
    %34 = arith.mulf %33, %32 : vector<8x256xf32>
    %cst_15 = arith.constant dense<0.000000e+00> : vector<8x256xf32>
    %35 = tpu.matmul %14, %31, %cst_15 {dimension_numbers = #tpu.dot_dimension_numbers<[1], [0], [0], [1], [0, 0, 1, 1], [], []>} : vector<8x256xbf16>, vector<256x256xbf16>, vector<8x256xf32> -> vector<8x256xf32>
    %36 = arith.addf %34, %35 : vector<8x256xf32>
    %c0_16 = arith.constant 0 : index
    %c0_17 = arith.constant 0 : index
    %37 = vector.load %arg8[%c0_16, %c0_17] : memref<8x256xf32, #tpu.memory_space<vmem>>, vector<8x256xf32>
    tpu.vector_store %arg8[%c0_16, %c0_17], %36 {strides = array<i32>} : memref<8x256xf32, #tpu.memory_space<vmem>>, vector<8x256xf32>,
    %c0_18 = arith.constant 0 : index
    %c0_19 = arith.constant 0 : index
    %38 = vector.load %arg6[%c0_18, %c0_19] : memref<1x256xf32, #tpu.memory_space<vmem>>, vector<1x256xf32>
    tpu.vector_store %arg6[%c0_18, %c0_19], %19 {strides = array<i32>} : memref<1x256xf32, #tpu.memory_space<vmem>>, vector<1x256xf32>,
    %c0_i32_20 = arith.constant 0 : i32
    %39 = arith.cmpi eq, %arg2, %c0_i32_20 : i32
    %40 = arith.extui %39 : i1 to i32
    %c0_i32_21 = arith.constant 0 : i32
    %41 = arith.cmpi ne, %40, %c0_i32_21 : i32
    scf.if %41 {
      %c0_22 = arith.constant 0 : index
      %c0_23 = arith.constant 0 : index
      %42 = memref.load %arg3[%c0_22, %c0_23] : memref<1x1xf32, #tpu.memory_space<smem>>
      %c0_24 = arith.constant 0 : index
      %c0_25 = arith.constant 0 : index
      %43 = vector.load %arg7[%c0_24, %c0_25] : memref<1x256xf32, #tpu.memory_space<vmem>>, vector<1x256xf32>
      %44 = tpu.reciprocal %43 {approx = true} : vector<1x256xf32> -> vector<1x256xf32>
      %c0_26 = arith.constant 0 : index
      %c0_27 = arith.constant 0 : index
      %45 = vector.load %arg8[%c0_26, %c0_27] : memref<8x256xf32, #tpu.memory_space<vmem>>, vector<8x256xf32>
      %46 = vector.broadcast %44 : vector<1x256xf32> to vector<8x256xf32>
      %47 = arith.mulf %45, %46 : vector<8x256xf32>
      %48 = vector.broadcast %42 : f32 to vector<8x256xf32>
      %49 = arith.mulf %48, %47 : vector<8x256xf32>
      %50 = arith.addf %49, %9 : vector<8x256xf32>
      %c0_28 = arith.constant 0 : index
      %c0_29 = arith.constant 0 : index
      %c0_30 = arith.constant 0 : index
      %51 = vector.load %arg5[%c0_28, %c0_29, %c0_30] : memref<1x8x256xf32, #tpu.memory_space<vmem>>, vector<1x8x256xf32>
      %52 = vector.shape_cast %51 : vector<1x8x256xf32> to vector<8x256xf32>
      %53 = vector.shape_cast %50 : vector<8x256xf32> to vector<1x8x256xf32>
      tpu.vector_store %arg5[%c0_28, %c0_29, %c0_30], %53 {strides = array<i32>} : memref<1x8x256xf32, #tpu.memory_space<vmem>>, vector<1x8x256xf32>,
    } else {
    }
    return
  }
  func.func @transform_0(%arg0: i32, %arg1: i32, %arg2: i32) -> (i32, i32) {
    %c0_i32 = arith.constant 0 : i32
    %c0_i32_0 = arith.constant 0 : i32
    %c0_i32_1 = arith.constant 0 : i32
    return %c0_i32, %c0_i32_0 : i32, i32
  }
  func.func @transform_1(%arg0: i32, %arg1: i32, %arg2: i32) -> (i32, i32, i32) {
    %c0_i32 = arith.constant 0 : i32
    %c0_i32_0 = arith.constant 0 : i32
    %c0_i32_1 = arith.constant 0 : i32
    return %arg0, %c0_i32, %c0_i32_0 : i32, i32, i32
  }
  func.func @transform_2(%arg0: i32, %arg1: i32, %arg2: i32) -> (i32, i32, i32) {
    %c0_i32 = arith.constant 0 : i32
    %c0_i32_0 = arith.constant 0 : i32
    return %arg0, %c0_i32, %arg1 : i32, i32, i32
  }
}

</mosaic_0001>

<bundles_post_ra>
// kernel: tpu_custom_call.1
= control target key start
LH: loop header
LB: loop body
LE: loop exit
PB: predicated region body
PF: predicated region fallthrough
CT: control target
= control target key end

     0   :  { %s2291_s0 = inlined_call_operand.<no memory space> [shape: f32[1,1], index: 0, kind: input, shape index: {}]   ;;  %s2292_s1 = inlined_call_operand.hbm [shape: f32[2,8,256], index: 1, kind: input, shape index: {}]   ;;  %s2293_s2 = inlined_call_operand.hbm [shape: f32[2,8,256], index: 2, kind: output, shape index: {}]  }
   0x1   :  { %7 = sst [smem:[#allocation5]] %s2291_s0 }
   0x2   :  { %8 = vsyncpa [#allocation7], 0 }
   0x3   :  { %10 = vsyncpa [#allocation7 + $0x1], 0 }
   0x4   :  { %11 = vsyncpa [#allocation8], 0 }
   0x5   :  { %13 = vsyncpa [#allocation8 + $0x1], 0  ;;  %s1493_s11 = smov 0   ;;  %s1495_s12 = smov 0  }
   0x6   :  { %s1497_s13 = smov 0   ;;  %s1499_s14 = smov 0  }
   0x7   :  { %s1501_s15 = smov 0   ;;  %s1503_s16 = smov 0  }
   0x8 LB: > { %s1121_s0 = sadd.s32 4294967295, %s1467_s16   ;;  %s1122_s17 = sadd.s32 4294967294, %s1467_s16   ;;  %s1467_s16 = sphi %s1503_s16, %s19_s16   ;;  %s1463_s15 = sphi %s1501_s15, %s2514_s15   ;;  %s1459_s14 = sphi %s1499_s14, %s2513_s14   ;;  %s1455_s13 = sphi %s1497_s13, %s2512_s13   ;;  %s1451_s12 = sphi %s1495_s12, %s2511_s12   ;;  %s1447_s11 = sphi %s1493_s11, %s2510_s11  }
   0x9   : > { %s38_s18 = sadd.s32 1, %s1463_s15  ;;  %s66_s19 = sadd.s32 1, %s1455_s13 }
   0xa   : > { %p40_p0 = scmp.ge.s32.totalorder %s38_s18, 2  ;;  %p73_p1 = scmp.ne.s32.totalorder %s1455_s13, %s1451_s12 }
   0xb   : > { %p74_p2 = scmp.eq.s32.totalorder %s1467_s16, 0  ;;  %p79_p3 = scmp.ne.s32.totalorder %s1451_s12, %s1447_s11 }
   0xc   : > { %s2516_s18 = smov (%p40_p0, %s38_s18), 0  ;;  %p80_p5 = scmp.eq.s32.totalorder %s1121_s0, 0 }
   0xd   : > { %p1534_p4 = por %p74_p2, %p73_p1  ;;  %s63_s21 = ssub.s32 %s1463_s15, %s2516_s18 }
   0xe   : > { %p105_p6 = scmp.eq.s32.totalorder %s1121_s0, 1  ;;  %p64_p7 = scmp.eq.s32.totalorder %s63_s21, 0 }
   0xf   : > { %p1540_p8 = por %p80_p5, %p79_p3  ;;  %p111_p10 = scmp.eq.s32.totalorder %s1122_s17, 1 }
  0x10   : > { %p1544_p9 = por %p105_p6, %p73_p1  ;;  %p1167_p13 = scmp.lt.s32.totalorder %s1467_s16, 2 }
  0x11   : > { %s1549_s24 = scalar_select %p64_p7, %s1455_s13, %s66_s19  }
  0x12   : > { %s2358_s23 = scalar_select %p1544_p9, 1, 0 }
  0x13   : > { %p1551_p11 = por %p111_p10, %p79_p3  ;;  %s134_s26 = sand.u32 1, %s1455_s13  }
  0x14   : > { %s1125_s27 = sshll.u32 %s134_s26, 4  ;;  %s1153_s28 = sshll.u32 %s1463_s15, 8 }
  0x15   : > { %s2359_s25 = scalar_select %p1551_p11, 1, 0 }
  0x16   : > { %s1562_s3 = scalar_lea.hbm %s2292_s1, %s1153_s28  ;;  %s138_s4 = scalar_lea.vmem [#allocation6], %s1125_s27 }
  0x17   : > { %s146_s5 = sshll.u32 %s138_s4, 4  ;;  %p1568_p0 = pnand %p1167_p13, %p1534_p4  ;;  %s1564_s5 = int_to_ptr.vmem [resolvable:$true] %s146_s5 }
  0x18   : > { %s135_s7 = scalar_lea.sflag [#allocation7], %s134_s26  ;;  %s1355_s8 = scalar_lea.hbm %s1562_s3, 256 }
  0x19   : > { %p1356_p3 = scmp.ne.s32.totalorder %s1562_s3, %s1355_s8  ;;  %p1357_p5 = pneg %p1568_p0 }
  0x1a   : > { %s1360_s0 = scalar_lea.hbm %s2292_s1, 512  ;;  %p1361_p4 = scmp.lt.u32.totalorder %s1562_s3, %s2292_s1 }
  0x1b   : > { %p1358_p6 = pnand %p1357_p5, %p1356_p3  ;;  %p1362_p10 = scmp.lt.u32.totalorder %s1360_s0, %s1355_s8 }
  0x1c   : > { %p1364_p12 = scmp.lt.u32.totalorder %s1355_s8, %s1562_s3 }
  0x1d   : > { %p1359_p7 = pneg %p1358_p6  ;;  %p1363_p13 = por %p1362_p10, %p1361_p4 }
  0x1f   : > { %p1365_p1 = por %p1364_p12, %p1363_p13 }
  0x21   : > { %p1366_p2 = pnand %p1365_p1, %p1359_p7 }
  0x23   : > { %1369 = shalt.err (!%p1366_p2)
}
  0x24   : > { %s1370_s20 = scalar_lea.vmem %s1564_s5, 256  ;;  %s1469_s21 = smov [#allocation6]  }
  0x25   : > { %p1371_p3 = scmp.ne.s32.totalorder %s1564_s5, %s1370_s20  ;;  %s1375_s26 = sshll.u32 %s1469_s21, 4  ;;  %s1376_s26 = int_to_ptr.vmem [resolvable:$false] %s1375_s26 }
  0x26   : > { %s1377_s27 = scalar_lea.vmem %s1376_s26, 512  ;;  %p1378_p9 = scmp.lt.s32.totalorder %s1564_s5, %s1376_s26 }
  0x27   : > { %p1373_p6 = pnand %p1371_p3, %p1357_p5  ;;  %p1379_p4 = scmp.lt.s32.totalorder %s1377_s27, %s1370_s20 }
  0x29   : > { %p1374_p11 = pneg %p1373_p6  ;;  %p1380_p10 = por %p1379_p4, %p1378_p9 }
  0x2b   : > { %p1381_p12 = pnand %p1380_p10, %p1374_p11 }
  0x2d   : > { %1384 = shalt.err (!%p1381_p12)
}
  0x2e   : > { %1162 = dma.hbm_to_vmem [thread:$0]  (!%p1568_p0), %s1562_s3, 256, %s1564_s5, %s135_s7  }
  0x2f   : > { %p2361_p1 = scmp.lt.s32.totalorder %s1467_s16, 3  ;;  %p2362_p2 = scmp.ge.s32.totalorder %s1467_s16, 1 }
  0x31   : > { %p152_p5 = pnand %p2362_p2, %p2361_p1 }
  0x33   : > { %155 = sbr.rel (%p152_p5) target bundleno = 849 (0x351), region = 28 }
  0x3a   : > { %s1604_s28 = sand.u32 1, %s1451_s12  }
  0x3b   : > { %s1129_s29 = sshll.u32 %s1604_s28, 4  ;;  %s158_s30 = scalar_lea.sflag [#allocation7], %s1604_s28 }
  0x3c   : > { %s1610_s4 = scalar_lea.vmem [#allocation6], %s1129_s29 }
  0x3d   : > { %1438 = dma.done.wait (%p1540_p8), %s158_s30, 256  }
  0x3e   : > { %1440 = vsyncadd (%p1540_p8), %s158_s30, 4294967040  ;;  %v1470_v0 = vmov 0   ;;  %v208_v1 = vld [vmem:[%s1610_s4] sm:$0xff]  ;;  %v209_v2 = vld [vmem:[%s1610_s4 + $0x8] sm:$0xff]  ;;  %vm295_vm0 = vcmask 1043456   ;;  %vm246_vm1 = vcmask 64512   ;;  %v2295_v26 = vlaneseq }
  0x3f   : > { %334 = vmatprep.mubr.bf16.mxu0 %v1470_v0  ;;  %v1618_v3 = vpack.c.bf16 %v208_v1, %v208_v1  ;;  %v213_v4 = vpack.c.bf16 %v209_v2, %v209_v2  ;;  %v2364_v30 = vmov 0  ;;  %v1471_v33 = vmov -inf   ;;  %s991_s22 = sld [smem:[#allocation5]]  ;;  %s1154_s3 = sshll.u32 %s1459_s14, 8 }
  0x40   : > { %vm1653_vm2 = vcmp.lt.s32.totalorder %v2295_v26, 256  ;;  %v1472_v34 = vmov 0.0   ;;  %s181_s5 = scalar_lea.vmem [#allocation9], %s1129_s29  ;;  %s2242_s9 = scalar_lea.hbm %s2293_s2, %s1154_s3 }
  0x41   : > { %2363 = vst [vmem:[#allocation12_spill] sm:$0xff] %v1618_v3  ;;  %214 = vxpose.xlu0.c.b16.start.end [1/1] (short) %v1618_v3, 128  ;;  %1131 = vmatprep.subr.msk.bf16.mxu0 %vm295_vm0, %v213_v4  ;;  %v297_v5 = vsel %vm295_vm0, %v1618_v3, 0  ;;  %v2365_v30 = vsel %vm1653_vm2, 4294967295, %v2364_v30  ;;  %192 = vst.msk [vmem:[#allocation2] sm:$0x3] %vm1653_vm2, %v1471_v33  ;;  %s1033_s6 = sshll.u32 %s181_s5, 4  ;;  %s2244_s6 = int_to_ptr.vmem [resolvable:$true] %s1033_s6 }
  0x42   : > { %303 = vmatpush1.bf16.msra.mxu0 %v297_v5  ;;  %974 = vmatprep.mubr.bf16.mxu1 %v213_v4  ;;  %2366 = vst [vmem:[#allocation13_spill] sm:$0xff] %v2365_v30  ;;  %193 = vst.msk [vmem:[#allocation3] sm:$0x3] %vm1653_vm2, %v1472_v34  ;;  %s1017_s14 = scalar_lea.sflag [#allocation8], %s1604_s28  ;;  %s1385_s10 = scalar_lea.vmem %s2244_s6, 256 }
  0x43   : > { %p1386_p8 = scmp.ne.s32.totalorder %s2244_s6, %s1385_s10  ;;  %p2507_p9 = scmp.ne.s32.totalorder %s2358_s23, 0 }
  0x44   : > { %s1474_s0 = smov [#allocation9]  }
  0x45   : > { %p1387_p11 = pnand %p1386_p8, %p2507_p9  ;;  %s1389_s17 = sshll.u32 %s1474_s0, 4  ;;  %s1390_s17 = int_to_ptr.vmem [resolvable:$false] %s1389_s17 }
  0x46   : > { %s1391_s19 = scalar_lea.vmem %s1390_s17, 512  ;;  %p1392_p7 = scmp.lt.s32.totalorder %s2244_s6, %s1390_s17 }
  0x47   : > { %p1388_p0 = pneg %p1387_p11  ;;  %p1393_p13 = scmp.lt.s32.totalorder %s1391_s19, %s1385_s10 }
  0x49   : > { %p1394_p3 = por %p1393_p13, %p1392_p7 }
  0x4b   : > { %p1395_p6 = pnand %p1394_p3, %p1388_p0 }
  0x5e   : > { %230 = vxpose.xlu0.c.b16.start.end [1/1] (short) %v213_v4, 128 }
  0xa7   : > { %v222_v6 = vpop.trf.xlu0 }
  0xa8   : > { %1132 = vmatmul.mubr.msk.bf16.vlgmr.msra.gmra.mrb[0].mxu0 %vm246_vm1, %v222_v6 }
  0xa9   : > { %344 = vmatprep.mubr.bf16.mxu0 %v1470_v0 }
  0xab   : > { %v223_v7 = vpop.trf.xlu0 }
  0xaf   : > { %v224_v8 = vpop.trf.xlu0 }
  0xb0   : > { %1133 = vmatmul.mubr.msk.bf16.gmra.mrb[4].mxu0 %vm246_vm1, %v223_v7 }
  0xb1   : > { %354 = vmatprep.mubr.bf16.mxu0 %v1470_v0 }
  0xb3   : > { %v225_v9 = vpop.trf.xlu0 }
  0xb7   : > { %v226_v10 = vpop.trf.xlu0 }
  0xb8   : > { %1134 = vmatmul.mubr.msk.bf16.gmra.mrb[8].mxu0 %vm246_vm1, %v224_v8 }
  0xb9   : > { %364 = vmatprep.mubr.bf16.mxu0 %v1470_v0 }
  0xbb   : > { %v227_v11 = vpop.trf.xlu0 }
  0xbf   : > { %v228_v12 = vpop.trf.xlu0 }
  0xc0   : > { %1135 = vmatmul.mubr.msk.bf16.gmra.mrb[12].mxu0 %vm246_vm1, %v225_v9 }
  0xc1   : > { %374 = vmatprep.mubr.bf16.mxu0 %v1470_v0 }
  0xc3   : > { %v229_v13 = vpop.trf.xlu0 }
  0xc7   : > { %v238_v14 = vpop.trf.xlu0 }
  0xc8   : > { %1136 = vmatmul.mubr.msk.bf16.gmra.mrb[16].mxu0 %vm246_vm1, %v226_v10 }
  0xc9   : > { %384 = vmatprep.mubr.bf16.mxu0 %v1470_v0 }
  0xcb   : > { %v239_v15 = vpop.trf.xlu0 }
  0xcf   : > { %v240_v16 = vpop.trf.xlu0 }
  0xd0   : > { %1137 = vmatmul.mubr.msk.bf16.gmra.mrb[20].mxu0 %vm246_vm1, %v227_v11 }
  0xd1   : > { %394 = vmatprep.mubr.bf16.mxu0 %v1470_v0 }
  0xd3   : > { %v241_v17 = vpop.trf.xlu0 }
  0xd7   : > { %v242_v18 = vpop.trf.xlu0 }
  0xd8   : > { %1138 = vmatmul.mubr.msk.bf16.gmra.mrb[24].mxu0 %vm246_vm1, %v228_v12 }
  0xd9   : > { %404 = vmatprep.mubr.bf16.mxu0 %v1470_v0 }
  0xdb   : > { %v243_v19 = vpop.trf.xlu0 }
  0xdf   : > { %v244_v20 = vpop.trf.xlu0 }
  0xe0   : > { %1139 = vmatmul.mubr.msk.bf16.gmra.mrb[28].mxu0 %vm246_vm1, %v229_v13 }
  0xe1   : > { %414 = vmatprep.mubr.bf16.mxu0 %v1470_v0 }
  0xe3   : > { %v245_v21 = vpop.trf.xlu0 }
  0xe8   : > { %1140 = vmatmul.mubr.msk.bf16.gmra.mrb[32].mxu0 %vm246_vm1, %v238_v14 }
  0xe9   : > { %424 = vmatprep.mubr.bf16.mxu0 %v1470_v0 }
  0xf0   : > { %1141 = vmatmul.mubr.msk.bf16.gmra.mrb[36].mxu0 %vm246_vm1, %v239_v15 }
  0xf1   : > { %434 = vmatprep.mubr.bf16.mxu0 %v1470_v0 }
  0xf8   : > { %1142 = vmatmul.mubr.msk.bf16.gmra.mrb[40].mxu0 %vm246_vm1, %v240_v16 }
  0xf9   : > { %444 = vmatprep.mubr.bf16.mxu0 %v1470_v0 }
 0x100   : > { %1143 = vmatmul.mubr.msk.bf16.gmra.mrb[44].mxu0 %vm246_vm1, %v241_v17 }
 0x101   : > { %454 = vmatprep.mubr.bf16.mxu0 %v1470_v0 }
 0x108   : > { %1144 = vmatmul.mubr.msk.bf16.gmra.mrb[48].mxu0 %vm246_vm1, %v242_v18 }
 0x109   : > { %464 = vmatprep.mubr.bf16.mxu0 %v1470_v0 }
 0x110   : > { %1145 = vmatmul.mubr.msk.bf16.gmra.mrb[52].mxu0 %vm246_vm1, %v243_v19 }
 0x111   : > { %474 = vmatprep.mubr.bf16.mxu0 %v1470_v0 }
 0x118   : > { %1146 = vmatmul.mubr.msk.bf16.gmra.mrb[56].mxu0 %vm246_vm1, %v244_v20 }
 0x119   : > { %484 = vmatprep.mubr.bf16.mxu0 %v1470_v0 }
 0x120   : > { %1147 = vmatmul.mubr.msk.bf16.gmra.mrb[60].mxu0 %vm246_vm1, %v245_v21 }
 0x17b   : > { %v1638_v22 = vpop.f32.mrb[0].mxu0 }
 0x17c   : > { %v1640_v23 = vpop.f32.mrb[1].mxu0 }
 0x17d   : > { %v1642_v24 = vpop.f32.mrb[2].mxu0 }
 0x17e   : > { %v1644_v25 = vpop.f32.mrb[3].mxu0 }
 0x183   : > { %v1646_v27 = vpop.f32.mrb[4].mxu0 }
 0x184   : > { %v496_v28 = vmax.f32 %v1638_v22, %v1646_v27  ;;  %v1650_v29 = vpop.f32.mrb[5].mxu0 }
 0x185   : > { %v533_v31 = vmax.f32 %v1640_v23, %v1650_v29  ;;  %v1659_v32 = vpop.f32.mrb[6].mxu0 }
 0x186   : > { %v497_v35 = vmax.f32 %v1642_v24, %v1659_v32  ;;  %v1667_v36 = vpop.f32.mrb[7].mxu0 }
 0x187   : > { %v534_v37 = vmax.f32 %v1644_v25, %v1667_v36 }
 0x18b   : > { %v1671_v38 = vpop.f32.mrb[8].mxu0 }
 0x18c   : > { %v498_v39 = vmax.f32 %v496_v28, %v1671_v38  ;;  %v1674_v40 = vpop.f32.mrb[9].mxu0 }
 0x18d   : > { %v535_v41 = vmax.f32 %v533_v31, %v1674_v40  ;;  %v1677_v42 = vpop.f32.mrb[10].mxu0 }
 0x18e   : > { %v499_v43 = vmax.f32 %v497_v35, %v1677_v42  ;;  %v1680_v44 = vpop.f32.mrb[11].mxu0 }
 0x18f   : > { %v536_v45 = vmax.f32 %v534_v37, %v1680_v44 }
 0x193   : > { %v1683_v46 = vpop.f32.mrb[12].mxu0 }
 0x194   : > { %v500_v47 = vmax.f32 %v498_v39, %v1683_v46  ;;  %v1686_v48 = vpop.f32.mrb[13].mxu0 }
 0x195   : > { %v537_v49 = vmax.f32 %v535_v41, %v1686_v48  ;;  %v1689_v50 = vpop.f32.mrb[14].mxu0 }
 0x196   : > { %v501_v51 = vmax.f32 %v499_v43, %v1689_v50  ;;  %v1692_v52 = vpop.f32.mrb[15].mxu0 }
 0x197   : > { %v538_v53 = vmax.f32 %v536_v45, %v1692_v52 }
 0x19b   : > { %v1695_v54 = vpop.f32.mrb[16].mxu0 }
 0x19c   : > { %v502_v55 = vmax.f32 %v500_v47, %v1695_v54  ;;  %v1698_v56 = vpop.f32.mrb[17].mxu0 }
 0x19d   : > { %v539_v57 = vmax.f32 %v537_v49, %v1698_v56  ;;  %v1701_v58 = vpop.f32.mrb[18].mxu0 }
 0x19e   : > { %v503_v59 = vmax.f32 %v501_v51, %v1701_v58  ;;  %v1704_v60 = vpop.f32.mrb[19].mxu0 }
 0x19f   : > { %v540_v61 = vmax.f32 %v538_v53, %v1704_v60 }
 0x1a3   : > { %v1707_v62 = vpop.f32.mrb[20].mxu0 }
 0x1a4   : > { %v504_v63 = vmax.f32 %v502_v55, %v1707_v62  ;;  %v1710_v0 = vpop.f32.mrb[21].mxu0 }
 0x1a5   : > { %v541_v1 = vmax.f32 %v539_v57, %v1710_v0  ;;  %v1713_v2 = vpop.f32.mrb[22].mxu0 }
 0x1a6   : > { %v505_v4 = vmax.f32 %v503_v59, %v1713_v2  ;;  %v1716_v5 = vpop.f32.mrb[23].mxu0 }
 0x1a7   : > { %v542_v6 = vmax.f32 %v540_v61, %v1716_v5 }
 0x1ab   : > { %v1719_v7 = vpop.f32.mrb[24].mxu0 }
 0x1ac   : > { %v506_v8 = vmax.f32 %v504_v63, %v1719_v7  ;;  %v1722_v9 = vpop.f32.mrb[25].mxu0 }
 0x1ad   : > { %v543_v10 = vmax.f32 %v541_v1, %v1722_v9  ;;  %v1725_v11 = vpop.f32.mrb[26].mxu0 }
 0x1ae   : > { %v507_v12 = vmax.f32 %v505_v4, %v1725_v11  ;;  %v1728_v13 = vpop.f32.mrb[27].mxu0 }
 0x1af   : > { %v544_v14 = vmax.f32 %v542_v6, %v1728_v13 }
 0x1b3   : > { %v1731_v15 = vpop.f32.mrb[28].mxu0 }
 0x1b4   : > { %v508_v16 = vmax.f32 %v506_v8, %v1731_v15  ;;  %v1734_v17 = vpop.f32.mrb[29].mxu0 }
 0x1b5   : > { %v545_v18 = vmax.f32 %v543_v10, %v1734_v17  ;;  %v1737_v19 = vpop.f32.mrb[30].mxu0 }
 0x1b6   : > { %v509_v20 = vmax.f32 %v507_v12, %v1737_v19  ;;  %v1740_v21 = vpop.f32.mrb[31].mxu0 }
 0x1b7   : > { %v546_v28 = vmax.f32 %v544_v14, %v1740_v21 }
 0x1bb   : > { %v1743_v31 = vpop.f32.mrb[32].mxu0 }
 0x1bc   : > { %v510_v33 = vmax.f32 %v508_v16, %v1743_v31  ;;  %v1746_v34 = vpop.f32.mrb[33].mxu0 }
 0x1bd   : > { %v547_v35 = vmax.f32 %v545_v18, %v1746_v34  ;;  %v1749_v37 = vpop.f32.mrb[34].mxu0 }
 0x1be   : > { %v511_v39 = vmax.f32 %v509_v20, %v1749_v37  ;;  %v1752_v41 = vpop.f32.mrb[35].mxu0 }
 0x1bf   : > { %v548_v43 = vmax.f32 %v546_v28, %v1752_v41 }
 0x1c3   : > { %v1755_v45 = vpop.f32.mrb[36].mxu0 }
 0x1c4   : > { %v512_v47 = vmax.f32 %v510_v33, %v1755_v45  ;;  %v1758_v49 = vpop.f32.mrb[37].mxu0 }
 0x1c5   : > { %v549_v51 = vmax.f32 %v547_v35, %v1758_v49  ;;  %v1761_v53 = vpop.f32.mrb[38].mxu0 }
 0x1c6   : > { %2367 = vst [vmem:[#allocation14_spill] sm:$0xff] %v1761_v53  ;;  %v513_v55 = vmax.f32 %v511_v39, %v1761_v53  ;;  %v1764_v57 = vpop.f32.mrb[39].mxu0 }
 0x1c7   : > { %2368 = vst [vmem:[#allocation15_spill] sm:$0xff] %v1764_v57  ;;  %v550_v59 = vmax.f32 %v548_v43, %v1764_v57 }
 0x1cb   : > { %v1767_v61 = vpop.f32.mrb[40].mxu0 }
 0x1cc   : > { %2369 = vst [vmem:[#allocation16_spill] sm:$0xff] %v1767_v61  ;;  %v514_v63 = vmax.f32 %v512_v47, %v1767_v61  ;;  %v1770_v1 = vpop.f32.mrb[41].mxu0 }
 0x1cd   : > { %2370 = vst [vmem:[#allocation17_spill] sm:$0xff] %v1770_v1  ;;  %v551_v4 = vmax.f32 %v549_v51, %v1770_v1  ;;  %v1773_v6 = vpop.f32.mrb[42].mxu0  ;;  %v2392_v1 = vlaneseq }
 0x1ce   : > { %2371 = vst [vmem:[#allocation18_spill] sm:$0xff] %v1773_v6  ;;  %v515_v8 = vmax.f32 %v513_v55, %v1773_v6  ;;  %v1776_v10 = vpop.f32.mrb[43].mxu0 }
 0x1cf   : > { %2372 = vst [vmem:[#allocation19_spill] sm:$0xff] %v1776_v10  ;;  %v552_v12 = vmax.f32 %v550_v59, %v1776_v10  ;;  %v577_v61 = vshrl.u32 %v2392_v1, 7 }
 0x1d3   : > { %v1779_v14 = vpop.f32.mrb[44].mxu0 }
 0x1d4   : > { %2373 = vst [vmem:[#allocation20_spill] sm:$0xff] %v1779_v14  ;;  %v516_v16 = vmax.f32 %v514_v63, %v1779_v14  ;;  %v1782_v18 = vpop.f32.mrb[45].mxu0  ;;  %v1473_v14 = vmov 1966171168  }
 0x1d5   : > { %2374 = vst [vmem:[#allocation21_spill] sm:$0xff] %v1782_v18  ;;  %v553_v20 = vmax.f32 %v551_v4, %v1782_v18  ;;  %v1785_v28 = vpop.f32.mrb[46].mxu0 }
 0x1d6   : > { %2375 = vst [vmem:[#allocation22_spill] sm:$0xff] %v1785_v28  ;;  %v517_v33 = vmax.f32 %v515_v8, %v1785_v28  ;;  %v1788_v35 = vpop.f32.mrb[47].mxu0 }
 0x1d7   : > { %2376 = vst [vmem:[#allocation23_spill] sm:$0xff] %v1788_v35  ;;  %v554_v39 = vmax.f32 %v552_v12, %v1788_v35 }
 0x1db   : > { %v1791_v43 = vpop.f32.mrb[48].mxu0  ;;  %v2404_v1 = vld [vmem:[#allocation20_spill] sm:$0xff] }
 0x1dc   : > { %2377 = vst [vmem:[#allocation24_spill] sm:$0xff] %v1791_v43  ;;  %v518_v47 = vmax.f32 %v516_v16, %v1791_v43  ;;  %v1794_v51 = vpop.f32.mrb[49].mxu0 }
 0x1dd   : > { %2378 = vst [vmem:[#allocation25_spill] sm:$0xff] %v1794_v51  ;;  %v555_v55 = vmax.f32 %v553_v20, %v1794_v51  ;;  %v1797_v59 = vpop.f32.mrb[50].mxu0 }
 0x1de   : > { %2379 = vst [vmem:[#allocation26_spill] sm:$0xff] %v1797_v59  ;;  %v519_v63 = vmax.f32 %v517_v33, %v1797_v59  ;;  %v1800_v4 = vpop.f32.mrb[51].mxu0 }
 0x1df   : > { %2380 = vst [vmem:[#allocation27_spill] sm:$0xff] %v1800_v4  ;;  %v556_v8 = vmax.f32 %v554_v39, %v1800_v4 }
 0x1e3   : > { %v1803_v26 = vpop.f32.mrb[52].mxu0 }
 0x1e4   : > { %2381 = vst [vmem:[#allocation28_spill] sm:$0xff] %v1803_v26  ;;  %v520_v12 = vmax.f32 %v518_v47, %v1803_v26  ;;  %v1806_v3 = vpop.f32.mrb[53].mxu0 }
 0x1e5   : > { %2382 = vst [vmem:[#allocation29_spill] sm:$0xff] %v1806_v3  ;;  %v557_v16 = vmax.f32 %v555_v55, %v1806_v3  ;;  %v1809_v43 = vpop.f32.mrb[54].mxu0 }
 0x1e6   : > { %2383 = vst [vmem:[#allocation30_spill] sm:$0xff] %v1809_v43  ;;  %v521_v20 = vmax.f32 %v519_v63, %v1809_v43  ;;  %v1812_v51 = vpop.f32.mrb[55].mxu0 }
 0x1e7   : > { %2384 = vst [vmem:[#allocation31_spill] sm:$0xff] %v1812_v51  ;;  %v558_v33 = vmax.f32 %v556_v8, %v1812_v51 }
 0x1eb   : > { %v1815_v59 = vpop.f32.mrb[56].mxu0 }
 0x1ec   : > { %2385 = vst [vmem:[#allocation32_spill] sm:$0xff] %v1815_v59  ;;  %v522_v39 = vmax.f32 %v520_v12, %v1815_v59  ;;  %v1818_v4 = vpop.f32.mrb[57].mxu0 }
 0x1ed   : > { %2386 = vst [vmem:[#allocation33_spill] sm:$0xff] %v1818_v4  ;;  %v559_v47 = vmax.f32 %v557_v16, %v1818_v4  ;;  %v1821_v26 = vpop.f32.mrb[58].mxu0 }
 0x1ee   : > { %2387 = vst [vmem:[#allocation34_spill] sm:$0xff] %v1821_v26  ;;  %v523_v55 = vmax.f32 %v521_v20, %v1821_v26  ;;  %v1824_v3 = vpop.f32.mrb[59].mxu0 }
 0x1ef   : > { %2388 = vst [vmem:[#allocation35_spill] sm:$0xff] %v1824_v3  ;;  %v560_v63 = vmax.f32 %v558_v33, %v1824_v3 }
 0x1f3   : > { %v1827_v43 = vpop.f32.mrb[60].mxu0 }
 0x1f4   : > { %2389 = vst [vmem:[#allocation36_spill] sm:$0xff] %v1827_v43  ;;  %v524_v8 = vmax.f32 %v522_v39, %v1827_v43  ;;  %v1830_v51 = vpop.f32.mrb[61].mxu0  ;;  %v574_v39 = vunpack.c.l.s4 %v1473_v14 }
 0x1f5   : > { %2390 = vst [vmem:[#allocation37_spill] sm:$0xff] %v1830_v51  ;;  %v561_v12 = vmax.f32 %v559_v47, %v1830_v51  ;;  %v1833_v59 = vpop.f32.mrb[62].mxu0 }
 0x1f6   : > { %2391 = vst [vmem:[#allocation38_spill] sm:$0xff] %v1833_v59  ;;  %v525_v16 = vmax.f32 %v523_v55, %v1833_v59  ;;  %v1836_v4 = vpop.f32.mrb[63].mxu0  ;;  %v575_v51 = vunpack.c.0.s8 %v574_v39  ;;  %v2398_v39 = vld [vmem:[#allocation14_spill] sm:$0xff] }
 0x1f7   : > { %v562_v20 = vmax.f32 %v560_v63, %v1836_v4 }
 0x1f8   : > { %v526_v26 = vmax.f32 %v524_v8, %v525_v16  ;;  %v1840_v63 = vsub.s32 %v575_v51, %v577_v61 }
 0x1f9   : > { %v563_v35 = vmax.f32 %v561_v12, %v562_v20  ;;  %v2406_v20 = vld [vmem:[#allocation22_spill] sm:$0xff] }
 0x1fa   : > { %v527_v28 = vrot.slane %v526_v26, 4  ;;  %2393 = vst [vmem:[#allocation39_spill] sm:$0xff] %v1840_v63 }
 0x1fb   : > { %v564_v33 = vrot.slane %v563_v35, 4 }
 0x1fc   : > { %v528_v3 = vmax.f32 %v526_v26, %v527_v28  ;;  %v1843_v26 = vld [vmem:[#allocation2] sm:$0x3]  ;;  %v1846_v28 = vsub.s32 0, %v577_v61 }
 0x1fd   : > { %v565_v18 = vmax.f32 %v563_v35, %v564_v33  ;;  %2394 = vst [vmem:[#allocation40_spill] sm:$0xff] %v1843_v26  ;;  %v2405_v33 = vld [vmem:[#allocation21_spill] sm:$0xff] }
 0x1fe   : > { %v529_v43 = vrot.slane %v528_v3, 2  ;;  %2395 = vst [vmem:[#allocation41_spill] sm:$0xff] %v1846_v28 }
 0x1ff   : > { %v566_v10 = vrot.slane %v565_v18, 2 }
 0x200   : > { %v530_v6 = vmax.f32 %v528_v3, %v529_v43  ;;  %v1848_v3 = vsub.s32 1, %v577_v61 }
 0x201   : > { %v567_v47 = vmax.f32 %v565_v18, %v566_v10 }
 0x202   : > { %v531_v55 = vrot.slane %v530_v6, 1  ;;  %2396 = vst [vmem:[#allocation42_spill] sm:$0xff] %v1848_v3 }
 0x203   : > { %v568_v59 = vrot.slane %v567_v47, 1 }
 0x204   : > { %v532_v57 = vmax.f32 %v530_v6, %v531_v55  ;;  %v2400_v55 = vld [vmem:[#allocation16_spill] sm:$0xff] }
 0x205   : > { %v569_v53 = vmax.f32 %v567_v47, %v568_v59  ;;  %v2399_v47 = vld [vmem:[#allocation15_spill] sm:$0xff]  ;;  %v2422_v59 = vld [vmem:[#allocation38_spill] sm:$0xff] }
 0x207   : > { %v572_v8 = vcombine.low %v532_v57, %v569_v53 }
 0x209   : > { %v579_v12 = vrot.slane %v572_v8, %v1840_v63  ;;  %v2401_v8 = vld [vmem:[#allocation17_spill] sm:$0xff] }
 0x20b   : > { %v586_v14 = vrot.slane %v579_v12, %v1840_v63  ;;  %v2402_v12 = vld [vmem:[#allocation18_spill] sm:$0xff] }
 0x20c   : > { %v2418_v63 = vld [vmem:[#allocation34_spill] sm:$0xff] }
 0x20d   : > { %v1851_v10 = vmax.f32 %v1843_v26, %v586_v14  ;;  %v2403_v14 = vld [vmem:[#allocation19_spill] sm:$0xff] }
 0x20f   : > { %2397 = vst [vmem:[#allocation43_spill] sm:$0xff] %v1851_v10  ;;  %v1857_v6 = vrot.slane %v1851_v10, %v1846_v28  ;;  %v1861_v53 = vrot.slane %v1851_v10, %v1848_v3  ;;  %987 = vst.msk [vmem:[#allocation2] sm:$0x3] %vm1653_vm2, %v1851_v10  ;;  %v2416_v28 = vld [vmem:[#allocation32_spill] sm:$0xff]  ;;  %v2419_v10 = vld [vmem:[#allocation35_spill] sm:$0xff] }
 0x211   : > { %v2423_v43 = vsub.f32 %v1638_v22, %v1857_v6  ;;  %v2424_v35 = vsub.f32 %v1640_v23, %v1861_v53  ;;  %v2425_v61 = vsub.f32 %v1642_v24, %v1857_v6  ;;  %v2426_v57 = vsub.f32 %v1644_v25, %v1861_v53 }
 0x212   : > { %v2427_v51 = vsub.f32 %v1646_v27, %v1857_v6  ;;  %v2428_v22 = vsub.f32 %v1650_v29, %v1861_v53  ;;  %v2429_v23 = vsub.f32 %v1659_v32, %v1857_v6  ;;  %v2430_v25 = vsub.f32 %v1667_v36, %v1861_v53 }
 0x213   : > { %v667_v30 = vmul.f32 1.442695, %v2423_v43  ;;  %v669_v18 = vmul.f32 1.442695, %v2424_v35  ;;  %v671_v26 = vmul.f32 1.442695, %v2425_v61  ;;  %v2431_v27 = vsub.f32 %v1671_v38, %v1857_v6 }
 0x214   : > { %v673_v16 = vmul.f32 1.442695, %v2426_v57  ;;  %v675_v3 = vmul.f32 1.442695, %v2427_v51  ;;  %v677_v43 = vmul.f32 1.442695, %v2428_v22  ;;  %v2432_v29 = vsub.f32 %v1674_v40, %v1861_v53 }
 0x215   : > { %1221 = vpow2.f32 %v667_v30  ;;  %v679_v24 = vmul.f32 1.442695, %v2429_v23  ;;  %v681_v57 = vmul.f32 1.442695, %v2430_v25  ;;  %v683_v30 = vmul.f32 1.442695, %v2431_v27 }
 0x216   : > { %1223 = vpow2.f32 %v669_v18  ;;  %v685_v61 = vmul.f32 1.442695, %v2432_v29  ;;  %v2433_v32 = vsub.f32 %v1677_v42, %v1857_v6  ;;  %v2434_v36 = vsub.f32 %v1680_v44, %v1861_v53 }
 0x217   : > { %1225 = vpow2.f32 %v671_v26  ;;  %v2435_v38 = vsub.f32 %v1683_v46, %v1857_v6  ;;  %v2436_v40 = vsub.f32 %v1686_v48, %v1861_v53  ;;  %v2437_v42 = vsub.f32 %v1689_v50, %v1857_v6 }
 0x218   : > { %1227 = vpow2.f32 %v673_v16  ;;  %v687_v26 = vmul.f32 1.442695, %v2433_v32  ;;  %v689_v18 = vmul.f32 1.442695, %v2434_v36  ;;  %v2438_v44 = vsub.f32 %v1692_v52, %v1861_v53 }
 0x219   : > { %1229 = vpow2.f32 %v675_v3  ;;  %v691_v3 = vmul.f32 1.442695, %v2435_v38  ;;  %v693_v35 = vmul.f32 1.442695, %v2436_v40  ;;  %v695_v16 = vmul.f32 1.442695, %v2437_v42 }
 0x21a   : > { %1231 = vpow2.f32 %v677_v43  ;;  %v697_v43 = vmul.f32 1.442695, %v2438_v44  ;;  %v2439_v46 = vsub.f32 %v1695_v54, %v1857_v6  ;;  %v2440_v25 = vsub.f32 %v1698_v56, %v1861_v53 }
 0x21b   : > { %1233 = vpow2.f32 %v679_v24  ;;  %v2441_v27 = vsub.f32 %v1701_v58, %v1857_v6  ;;  %v2442_v29 = vsub.f32 %v1704_v60, %v1861_v53  ;;  %v2443_v32 = vsub.f32 %v1707_v62, %v1857_v6 }
 0x21c   : > { %1235 = vpow2.f32 %v681_v57  ;;  %v699_v24 = vmul.f32 1.442695, %v2439_v46  ;;  %v701_v57 = vmul.f32 1.442695, %v2440_v25  ;;  %v2444_v36 = vsub.f32 %v1710_v0, %v1861_v53 }
 0x21d   : > { %1237 = vpow2.f32 %v683_v30  ;;  %v703_v30 = vmul.f32 1.442695, %v2441_v27  ;;  %v2445_v38 = vsub.f32 %v1713_v2, %v1857_v6  ;;  %v2447_v62 = vsub.f32 %v1719_v7, %v1857_v6 }
 0x21e   : > { %1239 = vpow2.f32 %v685_v61  ;;  %v705_v61 = vmul.f32 1.442695, %v2442_v29  ;;  %v2448_v0 = vsub.f32 %v1722_v9, %v1861_v53  ;;  %v2449_v44 = vsub.f32 %v1725_v11, %v1857_v6 }
 0x21f   : > { %v1222_v51 = vpop.eup %1221  ;;  %1241 = vpow2.f32 %v687_v26  ;;  %v707_v26 = vmul.f32 1.442695, %v2443_v32  ;;  %v711_v60 = vmul.f32 1.442695, %v2445_v38 }
 0x220   : > { %v1224_v22 = vpop.eup %1223  ;;  %1243 = vpow2.f32 %v689_v18  ;;  %v709_v18 = vmul.f32 1.442695, %v2444_v36 }
 0x221   : > { %v1226_v23 = vpop.eup %1225  ;;  %1245 = vpow2.f32 %v691_v3  ;;  %v2446_v3 = vsub.f32 %v1716_v5, %v1861_v53 }
 0x222   : > { %v1228_v48 = vpop.eup %1227  ;;  %1247 = vpow2.f32 %v693_v35  ;;  %v715_v35 = vmul.f32 1.442695, %v2447_v62  ;;  %v797_v2 = vadd.f32 %v1226_v23, %v1222_v51  ;;  %v895_v25 = vpack.c.bf16 %v1226_v23, %v1222_v51 }
 0x223   : > { %v1230_v50 = vpop.eup %1229  ;;  %1249 = vpow2.f32 %v695_v16  ;;  %v713_v40 = vmul.f32 1.442695, %v2446_v3  ;;  %v717_v16 = vmul.f32 1.442695, %v2448_v0  ;;  %v896_v5 = vpack.c.bf16 %v1228_v48, %v1224_v22 }
 0x224   : > { %v1232_v52 = vpop.eup %1231  ;;  %1251 = vpow2.f32 %v697_v43  ;;  %v719_v43 = vmul.f32 1.442695, %v2449_v44  ;;  %v798_v7 = vadd.f32 %v1230_v50, %v797_v2  ;;  %v2453_v3 = vsub.f32 %v1737_v19, %v1857_v6 }
 0x225   : > { %v1234_v54 = vpop.eup %1233  ;;  %1253 = vpow2.f32 %v699_v24  ;;  %v834_v24 = vadd.f32 %v1228_v48, %v1224_v22  ;;  %942 = vmatprep.subr.bf16.mxu1 %v896_v5  ;;  %v2451_v48 = vsub.f32 %v1731_v15, %v1857_v6  ;;  %v2457_v5 = vsub.f32 %v1749_v37, %v1857_v6 }
 0x226   : > { %v1236_v56 = vpop.eup %1235  ;;  %1255 = vpow2.f32 %v701_v57  ;;  %v799_v51 = vadd.f32 %v1234_v54, %v798_v7  ;;  %943 = vmatpush1.bf16.msra.mxu1 %v895_v25  ;;  %v727_v15 = vmul.f32 1.442695, %v2453_v3 }
 0x227   : > { %v2060_v58 = vpop.eup %1237  ;;  %1257 = vpow2.f32 %v703_v30  ;;  %v898_v27 = vpack.c.bf16 %v1236_v56, %v1232_v52  ;;  %v897_v30 = vpack.c.bf16 %v1234_v54, %v1230_v50  ;;  %v835_v9 = vadd.f32 %v1232_v52, %v834_v24 }
 0x228   : > { %v1240_v42 = vpop.eup %1239  ;;  %1259 = vpow2.f32 %v705_v61  ;;  %v723_v50 = vmul.f32 1.442695, %v2451_v48 }
 0x229   : > { %v1242_v46 = vpop.eup %1241  ;;  %1261 = vpow2.f32 %v707_v26  ;;  %v2450_v26 = vsub.f32 %v1728_v13, %v1861_v53  ;;  %v836_v36 = vadd.f32 %v1236_v56, %v835_v9  ;;  %944 = vmatprep.subr.bf16.mxu1 %v898_v27  ;;  %v2458_v27 = vsub.f32 %v1752_v41, %v1861_v53 }
 0x22a   : > { %v1244_v57 = vpop.eup %1243  ;;  %1263 = vpow2.f32 %v709_v18  ;;  %v899_v11 = vpack.c.bf16 %v1242_v46, %v2060_v58  ;;  %v2452_v18 = vsub.f32 %v1734_v17, %v1861_v53  ;;  %945 = vmatpush1.bf16.msra.mxu1 %v897_v30  ;;  %v2459_v9 = vsub.f32 %v1755_v45, %v1857_v6 }
 0x22b   : > { %v2077_v29 = vpop.eup %1245  ;;  %1265 = vpow2.f32 %v711_v60  ;;  %v900_v61 = vpack.c.bf16 %v1244_v57, %v1240_v42  ;;  %v721_v22 = vmul.f32 1.442695, %v2450_v26  ;;  %v800_v60 = vadd.f32 %v2060_v58, %v799_v51 }
 0x22c   : > { %v1248_v32 = vpop.eup %1247  ;;  %1267 = vpow2.f32 %v713_v40  ;;  %v725_v38 = vmul.f32 1.442695, %v2452_v18  ;;  %v837_v40 = vadd.f32 %v1240_v42, %v836_v36  ;;  %v2456_v42 = vsub.f32 %v1746_v34, %v1861_v53 }
 0x22d   : > { %v1250_v23 = vpop.eup %1249  ;;  %1269 = vpow2.f32 %v715_v35  ;;  %v2454_v35 = vsub.f32 %v1740_v21, %v1861_v53  ;;  %v801_v0 = vadd.f32 %v1242_v46, %v800_v60  ;;  %946 = vmatprep.subr.bf16.mxu1 %v900_v61  ;;  %v737_v34 = vmul.f32 1.442695, %v2458_v27 }
 0x22e   : > { %v1252_v52 = vpop.eup %1251  ;;  %1271 = vpow2.f32 %v717_v16  ;;  %v901_v13 = vpack.c.bf16 %v1250_v23, %v2077_v29  ;;  %v2455_v16 = vsub.f32 %v1743_v31, %v1857_v6  ;;  %v733_v2 = vmul.f32 1.442695, %v2456_v42  ;;  %947 = vmatpush1.bf16.msra.mxu1 %v899_v11 }
 0x22f   : > { %v2091_v54 = vpop.eup %1253  ;;  %1273 = vpow2.f32 %v719_v43  ;;  %v902_v56 = vpack.c.bf16 %v1252_v52, %v1248_v32  ;;  %v729_v17 = vmul.f32 1.442695, %v2454_v35  ;;  %v838_v43 = vadd.f32 %v1244_v57, %v837_v40 }
 0x230   : > { %v1256_v62 = vpop.eup %1255  ;;  %1275 = vpow2.f32 %v721_v22  ;;  %v731_v44 = vmul.f32 1.442695, %v2455_v16  ;;  %v802_v24 = vadd.f32 %v2077_v29, %v801_v0  ;;  %v735_v31 = vmul.f32 1.442695, %v2457_v5 }
 0x231   : > { %v1258_v58 = vpop.eup %1257  ;;  %1277 = vpow2.f32 %v723_v50  ;;  %v839_v25 = vadd.f32 %v1248_v32, %v838_v43  ;;  %v739_v61 = vmul.f32 1.442695, %v2459_v9  ;;  %948 = vmatprep.subr.bf16.mxu1 %v902_v56  ;;  %v2460_v32 = vsub.f32 %v1758_v49, %v1861_v53 }
 0x232   : > { %v1260_v19 = vpop.eup %1259  ;;  %1279 = vpow2.f32 %v725_v38  ;;  %v903_v21 = vpack.c.bf16 %v1258_v58, %v2091_v54  ;;  %v803_v30 = vadd.f32 %v1250_v23, %v802_v24  ;;  %v2461_v11 = vsub.f32 %v2398_v39, %v1857_v6  ;;  %949 = vmatpush1.bf16.msra.mxu1 %v901_v13 }
 0x233   : > { %v2107_v46 = vpop.eup %1261  ;;  %1281 = vpow2.f32 %v727_v15  ;;  %v904_v57 = vpack.c.bf16 %v1260_v19, %v1256_v62  ;;  %v840_v26 = vadd.f32 %v1252_v52, %v839_v25  ;;  %v741_v22 = vmul.f32 1.442695, %v2460_v32 }
 0x234   : > { %v1264_v7 = vpop.eup %1263  ;;  %1283 = vpow2.f32 %v729_v17  ;;  %v804_v51 = vadd.f32 %v2091_v54, %v803_v30  ;;  %v743_v45 = vmul.f32 1.442695, %v2461_v11  ;;  %v2462_v52 = vsub.f32 %v2399_v47, %v1861_v53 }
 0x235   : > { %v1266_v29 = vpop.eup %1265  ;;  %1285 = vpow2.f32 %v731_v44  ;;  %v841_v48 = vadd.f32 %v1256_v62, %v840_v26  ;;  %v2463_v60 = vsub.f32 %v2400_v55, %v1857_v6  ;;  %950 = vmatprep.subr.bf16.mxu1 %v904_v57  ;;  %v2464_v15 = vsub.f32 %v2401_v8, %v1861_v53 }
 0x236   : > { %v1268_v37 = vpop.eup %1267  ;;  %1287 = vpow2.f32 %v733_v2  ;;  %v905_v41 = vpack.c.bf16 %v1266_v29, %v2107_v46  ;;  %v745_v49 = vmul.f32 1.442695, %v2462_v52  ;;  %v805_v18 = vadd.f32 %v1258_v58, %v804_v51  ;;  %951 = vmatpush1.bf16.msra.mxu1 %v903_v21 }
 0x237   : > { %v2123_v23 = vpop.eup %1269  ;;  %1289 = vpow2.f32 %v735_v31  ;;  %v906_v50 = vpack.c.bf16 %v1268_v37, %v1264_v7  ;;  %v747_v54 = vmul.f32 1.442695, %v2463_v60  ;;  %v842_v3 = vadd.f32 %v1260_v19, %v841_v48 }
 0x238   : > { %v1272_v36 = vpop.eup %1271  ;;  %1291 = vpow2.f32 %v737_v34  ;;  %v749_v40 = vmul.f32 1.442695, %v2464_v15  ;;  %v806_v56 = vadd.f32 %v2107_v46, %v805_v18  ;;  %v2465_v13 = vsub.f32 %v2402_v12, %v1857_v6 }
 0x239   : > { %v1274_v38 = vpop.eup %1273  ;;  %1293 = vpow2.f32 %v739_v61  ;;  %v843_v35 = vadd.f32 %v1264_v7, %v842_v3  ;;  %v2466_v58 = vsub.f32 %v2403_v14, %v1861_v53  ;;  %v2467_v43 = vsub.f32 %v2404_v1, %v1857_v6  ;;  %952 = vmatprep.subr.bf16.mxu1 %v906_v50  ;;  %v2470_v7 = vld [vmem:[#allocation23_spill] sm:$0xff]  ;;  %v2480_v3 = vld [vmem:[#allocation28_spill] sm:$0xff] }
 0x23a   : > { %v1276_v39 = vpop.eup %1275  ;;  %1295 = vpow2.f32 %v741_v22  ;;  %v907_v47 = vpack.c.bf16 %v1274_v38, %v2123_v23  ;;  %v751_v55 = vmul.f32 1.442695, %v2465_v13  ;;  %v807_v16 = vadd.f32 %v1266_v29, %v806_v56  ;;  %953 = vmatpush1.bf16.msra.mxu1 %v905_v41  ;;  %v2472_v29 = vld [vmem:[#allocation24_spill] sm:$0xff]  ;;  %v2476_v41 = vld [vmem:[#allocation26_spill] sm:$0xff] }
 0x23b   : > { %v2139_v62 = vpop.eup %1277  ;;  %1297 = vpow2.f32 %v743_v45  ;;  %v908_v17 = vpack.c.bf16 %v1276_v39, %v1272_v36  ;;  %v753_v8 = vmul.f32 1.442695, %v2466_v58  ;;  %v755_v19 = vmul.f32 1.442695, %v2467_v43 }
 0x23c   : > { %v1280_v0 = vpop.eup %1279  ;;  %1299 = vpow2.f32 %v745_v49  ;;  %v844_v42 = vadd.f32 %v1268_v37, %v843_v35  ;;  %v2468_v2 = vsub.f32 %v2405_v33, %v1861_v53  ;;  %v808_v46 = vadd.f32 %v2123_v23, %v807_v16  ;;  %v2474_v37 = vld [vmem:[#allocation25_spill] sm:$0xff]  ;;  %v2478_v49 = vld [vmem:[#allocation27_spill] sm:$0xff] }
 0x23d   : > { %v1282_v44 = vpop.eup %1281  ;;  %1301 = vpow2.f32 %v747_v54  ;;  %v2469_v21 = vsub.f32 %v2406_v20, %v1857_v6  ;;  %v2471_v27 = vsub.f32 %v2470_v7, %v1861_v53  ;;  %v2473_v9 = vsub.f32 %v2472_v29, %v1857_v6  ;;  %954 = vmatprep.subr.bf16.mxu1 %v908_v17 }
 0x23e   : > { %v1284_v12 = vpop.eup %1283  ;;  %1303 = vpow2.f32 %v749_v40  ;;  %v757_v24 = vmul.f32 1.442695, %v2468_v2  ;;  %v909_v14 = vpack.c.bf16 %v1282_v44, %v2139_v62  ;;  %v845_v31 = vadd.f32 %v1272_v36, %v844_v42  ;;  %955 = vmatpush1.bf16.msra.mxu1 %v907_v47  ;;  %v2484_v47 = vld [vmem:[#allocation30_spill] sm:$0xff] }
 0x23f   : > { %v2155_v5 = vpop.eup %1285  ;;  %1305 = vpow2.f32 %v751_v55  ;;  %v759_v1 = vmul.f32 1.442695, %v2469_v21  ;;  %v910_v25 = vpack.c.bf16 %v1284_v12, %v1280_v0  ;;  %v761_v33 = vmul.f32 1.442695, %v2471_v27 }
 0x240   : > { %v1288_v57 = vpop.eup %1287  ;;  %1307 = vpow2.f32 %v753_v8  ;;  %v809_v34 = vadd.f32 %v1274_v38, %v808_v46  ;;  %v763_v61 = vmul.f32 1.442695, %v2473_v9  ;;  %v846_v26 = vadd.f32 %v1276_v39, %v845_v31  ;;  %v2489_v31 = vld [vmem:[#allocation33_spill] sm:$0xff] }
 0x241   : > { %v1290_v30 = vpop.eup %1289  ;;  %1309 = vpow2.f32 %v755_v19  ;;  %v2475_v32 = vsub.f32 %v2474_v37, %v1861_v53  ;;  %v2477_v45 = vsub.f32 %v2476_v41, %v1857_v6  ;;  %v2479_v18 = vsub.f32 %v2478_v49, %v1861_v53  ;;  %956 = vmatprep.subr.bf16.mxu1 %v910_v25  ;;  %v2486_v19 = vld [vmem:[#allocation31_spill] sm:$0xff]  ;;  %v2493_v37 = vld [vmem:[#allocation36_spill] sm:$0xff] }
 0x242   : > { %v1292_v20 = vpop.eup %1291  ;;  %1311 = vpow2.f32 %v757_v24  ;;  %v810_v51 = vadd.f32 %v2139_v62, %v809_v34  ;;  %v911_v23 = vpack.c.bf16 %v1290_v30, %v2155_v5  ;;  %v847_v50 = vadd.f32 %v1280_v0, %v846_v26  ;;  %v2482_v62 = vld [vmem:[#allocation29_spill] sm:$0xff]  ;;  %957 = vmatpush1.bf16.msra.mxu1 %v909_v14 }
 0x243   : > { %v765_v22 = vmul.f32 1.442695, %v2475_v32  ;;  %v2171_v11 = vpop.eup %1293  ;;  %1313 = vpow2.f32 %v759_v1  ;;  %v767_v48 = vmul.f32 1.442695, %v2477_v45  ;;  %v912_v36 = vpack.c.bf16 %v1292_v20, %v1288_v57 }
 0x244   : > { %v1296_v52 = vpop.eup %1295  ;;  %1315 = vpow2.f32 %v761_v33  ;;  %v769_v38 = vmul.f32 1.442695, %v2479_v18  ;;  %v811_v60 = vadd.f32 %v1282_v44, %v810_v51  ;;  %v2481_v39 = vsub.f32 %v2480_v3, %v1857_v6 }
 0x245   : > { %v1298_v54 = vpop.eup %1297  ;;  %1317 = vpow2.f32 %v763_v61  ;;  %v848_v40 = vadd.f32 %v1284_v12, %v847_v50  ;;  %v2483_v13 = vsub.f32 %v2482_v62, %v1861_v53  ;;  %v2485_v58 = vsub.f32 %v2484_v47, %v1857_v6  ;;  %958 = vmatprep.subr.bf16.mxu1 %v912_v36 }
 0x246   : > { %v771_v15 = vmul.f32 1.442695, %v2481_v39  ;;  %v1300_v56 = vpop.eup %1299  ;;  %1319 = vpow2.f32 %v765_v22  ;;  %v812_v35 = vadd.f32 %v2155_v5, %v811_v60  ;;  %v913_v17 = vpack.c.bf16 %v1298_v54, %v2171_v11  ;;  %959 = vmatpush1.bf16.msra.mxu1 %v911_v23 }
 0x247   : > { %v773_v55 = vmul.f32 1.442695, %v2483_v13  ;;  %v2187_v0 = vpop.eup %1301  ;;  %1321 = vpow2.f32 %v767_v48  ;;  %v775_v8 = vmul.f32 1.442695, %v2485_v58  ;;  %v849_v16 = vadd.f32 %v1288_v57, %v848_v40 }
 0x248   : > { %v914_v44 = vpack.c.bf16 %v1300_v56, %v1296_v52  ;;  %v1304_v43 = vpop.eup %1303  ;;  %1323 = vpow2.f32 %v769_v38  ;;  %v2487_v42 = vsub.f32 %v2486_v19, %v1861_v53  ;;  %v813_v2 = vadd.f32 %v1290_v30, %v812_v35 }
 0x249   : > { %v1306_v24 = vpop.eup %1305  ;;  %1325 = vpow2.f32 %v771_v15  ;;  %v2488_v46 = vsub.f32 %v2416_v28, %v1857_v6  ;;  %v850_v21 = vadd.f32 %v1292_v20, %v849_v16  ;;  %v2490_v25 = vsub.f32 %v2489_v31, %v1861_v53 }
 0x24a   : > { %v777_v12 = vmul.f32 1.442695, %v2487_v42  ;;  %v1308_v1 = vpop.eup %1307  ;;  %1327 = vpow2.f32 %v773_v55  ;;  %v814_v7 = vadd.f32 %v2171_v11, %v813_v2  ;;  %v915_v27 = vpack.c.bf16 %v1306_v24, %v2187_v0  ;;  %960 = vmatprep.subr.bf16.mxu1 %v914_v44  ;;  %v2495_v11 = vld [vmem:[#allocation37_spill] sm:$0xff] }
 0x24b   : > { %v779_v5 = vmul.f32 1.442695, %v2488_v46  ;;  %v781_v57 = vmul.f32 1.442695, %v2490_v25  ;;  %v1310_v33 = vpop.eup %1309  ;;  %1329 = vpow2.f32 %v775_v8  ;;  %v2491_v14 = vsub.f32 %v2418_v63, %v1857_v6  ;;  %961 = vmatpush1.bf16.msra.mxu1 %v913_v17 }
 0x24c   : > { %v851_v28 = vadd.f32 %v1296_v52, %v850_v21  ;;  %v916_v30 = vpack.c.bf16 %v1308_v1, %v1304_v43  ;;  %v1312_v29 = vpop.eup %1311  ;;  %1331 = vpow2.f32 %v777_v12  ;;  %v2492_v9 = vsub.f32 %v2419_v10, %v1861_v53 }
 0x24d   : > { %v783_v34 = vmul.f32 1.442695, %v2491_v14  ;;  %v815_v26 = vadd.f32 %v1298_v54, %v814_v7  ;;  %v1314_v20 = vpop.eup %1313  ;;  %1333 = vpow2.f32 %v779_v5  ;;  %v2494_v32 = vsub.f32 %v2493_v37, %v1857_v6 }
 0x24e   : > { %v785_v61 = vmul.f32 1.442695, %v2492_v9  ;;  %v852_v51 = vadd.f32 %v1300_v56, %v851_v28  ;;  %v1316_v63 = vpop.eup %1315  ;;  %1335 = vpow2.f32 %v781_v57  ;;  %v2496_v41 = vsub.f32 %v2495_v11, %v1861_v53  ;;  %962 = vmatprep.subr.bf16.mxu1 %v916_v30 }
 0x24f   : > { %v787_v22 = vmul.f32 1.442695, %v2494_v32  ;;  %v816_v48 = vadd.f32 %v2187_v0, %v815_v26  ;;  %v917_v10 = vpack.c.bf16 %v1314_v20, %v1310_v33  ;;  %v1318_v50 = vpop.eup %1317  ;;  %1337 = vpow2.f32 %v783_v34  ;;  %963 = vmatpush1.bf16.msra.mxu1 %v915_v27  ;;  %v2499_v26 = vld [vmem:[#allocation40_spill] sm:$0xff] }
 0x250   : > { %v789_v45 = vmul.f32 1.442695, %v2496_v41  ;;  %v2497_v23 = vsub.f32 %v2422_v59, %v1857_v6  ;;  %v853_v52 = vadd.f32 %v1304_v43, %v852_v51  ;;  %v918_v49 = vpack.c.bf16 %v1316_v63, %v1312_v29  ;;  %v1320_v18 = vpop.eup %1319 }
 0x251   : > { %1339 = vpow2.f32 %v785_v61  ;;  %v2498_v38 = vsub.f32 %v1836_v4, %v1861_v53  ;;  %v817_v54 = vadd.f32 %v1306_v24, %v816_v48  ;;  %v1322_v3 = vpop.eup %1321  ;;  %v2502_v48 = vld [vmem:[#allocation12_spill] sm:$0xff] }
 0x252   : > { %v791_v36 = vmul.f32 1.442695, %v2497_v23  ;;  %1341 = vpow2.f32 %v787_v22  ;;  %v854_v39 = vadd.f32 %v1308_v1, %v853_v52  ;;  %v1324_v15 = vpop.eup %1323  ;;  %v919_v56 = vpack.c.bf16 %v1322_v3, %v1318_v50  ;;  %964 = vmatprep.subr.bf16.mxu1 %v918_v49 }
 0x253   : > { %v793_v60 = vmul.f32 1.442695, %v2498_v38  ;;  %1343 = vpow2.f32 %v789_v45  ;;  %v818_v40 = vadd.f32 %v1310_v33, %v817_v54  ;;  %v1326_v6 = vpop.eup %1325  ;;  %v920_v62 = vpack.c.bf16 %v1324_v15, %v1320_v18  ;;  %965 = vmatpush1.bf16.msra.mxu1 %v917_v10  ;;  %v2503_v54 = vld [vmem:[#allocation39_spill] sm:$0xff] }
 0x254   : > { %1345 = vpow2.f32 %v791_v36  ;;  %v855_v59 = vadd.f32 %v1312_v29, %v854_v39  ;;  %v1328_v13 = vpop.eup %1327 }
 0x255   : > { %1347 = vpow2.f32 %v793_v60  ;;  %v819_v55 = vadd.f32 %v1314_v20, %v818_v40  ;;  %v1330_v4 = vpop.eup %1329  ;;  %966 = vmatprep.subr.bf16.mxu1 %v920_v62  ;;  %v2500_v20 = vld [vmem:[#allocation43_spill] sm:$0xff] }
 0x256   : > { %v856_v53 = vadd.f32 %v1316_v63, %v855_v59  ;;  %v1332_v35 = vpop.eup %1331  ;;  %v921_v0 = vpack.c.bf16 %v1330_v4, %v1326_v6  ;;  %v2501_v37 = vsub.f32 %v2499_v26, %v2500_v20  ;;  %v795_v60 = vld [vmem:[#allocation3] sm:$0x3]  ;;  %v2505_v59 = vld [vmem:[#allocation41_spill] sm:$0xff] }
 0x257   : > { %v820_v17 = vadd.f32 %v1318_v50, %v819_v55  ;;  %v1334_v47 = vpop.eup %1333  ;;  %v922_v8 = vpack.c.bf16 %v1332_v35, %v1328_v13  ;;  %967 = vmatpush1.bf16.msra.mxu1 %v919_v56 }
 0x258   : > { %v857_v58 = vadd.f32 %v1320_v18, %v856_v53  ;;  %v1336_v16 = vpop.eup %1335  ;;  %v590_v32 = vmul.f32 1.442695, %v2501_v37 }
 0x259   : > { %v821_v44 = vadd.f32 %v1322_v3, %v820_v17  ;;  %v1338_v43 = vpop.eup %1337  ;;  %968 = vmatprep.subr.bf16.mxu1 %v922_v8  ;;  %v1009_v8 = vstv %s991_s22 }
 0x25a   : > { %v858_v19 = vadd.f32 %v1324_v15, %v857_v58  ;;  %v923_v2 = vpack.c.bf16 %v1338_v43, %v1334_v47  ;;  %1349 = vpow2.f32 %v590_v32 }
 0x25b   : > { %v1340_v42 = vpop.eup %1339  ;;  %v822_v12 = vadd.f32 %v1326_v6, %v821_v44  ;;  %969 = vmatpush1.bf16.msra.mxu1 %v921_v0 }
 0x25c   : > { %v1342_v24 = vpop.eup %1341  ;;  %v859_v46 = vadd.f32 %v1328_v13, %v858_v19  ;;  %v924_v5 = vpack.c.bf16 %v1340_v42, %v1336_v16  ;;  %v2506_v13 = vld [vmem:[#allocation42_spill] sm:$0xff] }
 0x25d   : > { %v1344_v21 = vpop.eup %1343  ;;  %v823_v1 = vadd.f32 %v1330_v4, %v822_v12 }
 0x25e   : > { %v1346_v31 = vpop.eup %1345  ;;  %v860_v25 = vadd.f32 %v1332_v35, %v859_v46  ;;  %970 = vmatprep.subr.bf16.mxu1 %v924_v5  ;;  %v1353_v46 = vld [vmem:[%s1610_s4] sm:$0xff] }
 0x25f   : > { %v1348_v57 = vpop.eup %1347  ;;  %v824_v7 = vadd.f32 %v1334_v47, %v823_v1  ;;  %v925_v27 = vpack.c.bf16 %v1346_v31, %v1342_v24  ;;  %971 = vmatpush1.bf16.msra.mxu1 %v923_v2 }
 0x260   : > { %v861_v33 = vadd.f32 %v1336_v16, %v860_v25  ;;  %v926_v14 = vpack.c.bf16 %v1348_v57, %v1344_v21 }
 0x261   : > { %v825_v34 = vadd.f32 %v1338_v43, %v824_v7 }
 0x262   : > { %v862_v28 = vadd.f32 %v1340_v42, %v861_v33  ;;  %972 = vmatprep.subr.bf16.mxu1 %v926_v14 }
 0x263   : > { %v826_v30 = vadd.f32 %v1342_v24, %v825_v34  ;;  %973 = vmatpush1.bf16.msra.mxu1 %v925_v27 }
 0x264   : > { %v863_v29 = vadd.f32 %v1344_v21, %v862_v28  ;;  %v1350_v38 = vpop.eup %1349  ;;  %v1354_v21 = vld [vmem:[%s1610_s4 + $0x8] sm:$0xff] }
 0x265   : > { %v827_v9 = vadd.f32 %v1346_v31, %v826_v30  ;;  %v796_v39 = vmul.f32 %v1350_v38, %v795_v60  ;;  %v933_v62 = vrot.slane %v1350_v38, %v2505_v59  ;;  %v937_v55 = vrot.slane %v1350_v38, %v2506_v13 }
 0x266   : > { %v864_v61 = vadd.f32 %v1348_v57, %v863_v29  ;;  %975 = vmatmul.mubr.bf16.vlgmr.msra.gmra.mrb[0].mxu1 %v2502_v48 }
 0x267   : > { %v828_v22 = vrot.slane %v827_v9, 4  ;;  %v940_v53 = vmul.f32 0.0, %v933_v62  ;;  %v941_v17 = vmul.f32 0.0, %v937_v55 }
 0x268   : > { %v865_v51 = vrot.slane %v864_v61, 4 }
 0x269   : > { %v829_v63 = vadd.f32 %v828_v22, %v827_v9 }
 0x26a   : > { %v866_v11 = vadd.f32 %v865_v51, %v864_v61 }
 0x26b   : > { %v830_v41 = vrot.slane %v829_v63, 2 }
 0x26c   : > { %v867_v45 = vrot.slane %v866_v11, 2 }
 0x26d   : > { %v831_v10 = vadd.f32 %v830_v41, %v829_v63 }
 0x26e   : > { %v868_v50 = vadd.f32 %v867_v45, %v866_v11 }
 0x26f   : > { %v832_v23 = vrot.slane %v831_v10, 1 }
 0x270   : > { %v869_v36 = vrot.slane %v868_v50, 1 }
 0x271   : > { %v833_v52 = vadd.f32 %v832_v23, %v831_v10 }
 0x272   : > { %v870_v49 = vadd.f32 %v869_v36, %v868_v50 }
 0x274   : > { %v873_v18 = vcombine.low %v833_v52, %v870_v49 }
 0x276   : > { %v880_v3 = vrot.slane %v873_v18, %v2503_v54 }
 0x278   : > { %v887_v15 = vrot.slane %v880_v3, %v2503_v54 }
 0x27a   : > { %v889_v40 = vadd.f32 %v887_v15, %v796_v39 }
 0x27c   : > { %894 = vst.msk [vmem:[#allocation3] sm:$0x3] %vm1653_vm2, %v889_v40 }
 0x283   : > { %v992_v6 = vld [vmem:[#allocation3] sm:$0x3] }
 0x284   : > { %1351 = vrcp.f32 %v992_v6 }
 0x28e   : > { %v1352_v4 = vpop.eup %1351 }
 0x28f   : > { %v1000_v47 = vrot.slane %v1352_v4, %v2505_v59  ;;  %v1004_v44 = vrot.slane %v1352_v4, %v2506_v13 }
 0x339   : > { %v976_v35 = vpop.f32.mrb[0].mxu1 }
 0x33a   : > { %v983_v0 = vadd.f32 %v976_v35, %v940_v53  ;;  %v978_v58 = vpop.f32.mrb[1].mxu1 }
 0x33b   : > { %v984_v16 = vadd.f32 %v978_v58, %v941_v17  ;;  %v980_v43 = vpop.f32.mrb[2].mxu1 }
 0x33c   : > { %v1007_v19 = vmul.f32 %v1000_v47, %v983_v0  ;;  %v981_v42 = vpop.f32.mrb[3].mxu1 }
 0x33d   : > { %v1008_v12 = vmul.f32 %v1004_v44, %v984_v16 }
 0x33e   : > { %v1010_v2 = vmul.f32 %v1009_v8, %v1007_v19 }
 0x33f   : > { %v1011_v24 = vmul.f32 %v1009_v8, %v1008_v12 }
 0x340   : > { %v1012_v5 = vadd.f32 %v1353_v46, %v1010_v2 }
 0x341   : > { %v1013_v1 = vadd.f32 %v1354_v21, %v1011_v24 }
 0x342   : > { %1014 = vst [vmem:[%s181_s5] sm:$0xff] %v1012_v5 }
 0x343   : > { %1015 = vst [vmem:[%s181_s5 + $0x8] sm:$0xff] %v1013_v1 }
 0x344   : > { %1398 = shalt.err (!%p1395_p6)
}
 0x345   : > { %s1399_s20 = scalar_lea.hbm %s2242_s9, 256  ;;  %s1403_s27 = scalar_lea.hbm %s2293_s2, 512 }
 0x346   : > { %p1400_p4 = scmp.ne.s32.totalorder %s2242_s9, %s1399_s20  ;;  %p1404_p1 = scmp.lt.u32.totalorder %s2242_s9, %s2293_s2 }
 0x347   : > { %p1405_p2 = scmp.lt.u32.totalorder %s1403_s27, %s1399_s20  ;;  %p1407_p8 = scmp.lt.u32.totalorder %s1399_s20, %s2242_s9 }
 0x348   : > { %p1401_p10 = pnand %p1400_p4, %p2507_p9 }
 0x349   : > { %p1406_p5 = por %p1405_p2, %p1404_p1 }
 0x34a   : > { %p1402_p12 = pneg %p1401_p10 }
 0x34b   : > { %p1408_p11 = por %p1407_p8, %p1406_p5 }
 0x34d   : > { %p1409_p0 = pnand %p1408_p11, %p1402_p12 }
 0x34f   : > { %1412 = shalt.err (!%p1409_p0)
}
 0x350   : > { %1157 = dma.vmem_to_hbm [thread:$0]  (%p2507_p9), %s2244_s6, 256, %s2242_s9, %s1017_s14  }
 0x351 PF: > { %s1045_s30 = sand.u32 1, %s1447_s11   ;;  %p2508_p7 = scmp.ne.s32.totalorder %s2359_s25, 0 }
 0x352   : > { %p2509_p13 = scmp.ge.s32.totalorder %s1467_s16, 2  ;;  %s1046_s4 = scalar_lea.sflag [#allocation8], %s1045_s30 }
 0x354   : > { %p1164_p3 = pnand %p2509_p13, %p2508_p7 }
 0x356   : > { %1442 = dma.done.wait (!%p1164_p3), %s1046_s4, 256  }
 0x357   : > { %1444 = vsyncadd (!%p1164_p3), %s1046_s4, 4294967040  ;;  %s19_s16 = sadd.s32 1, %s1467_s16   ;;  %s2510_s11 = smov %s1451_s12 }
 0x358   : > { %p16_p6 = scmp.ge.s32.totalorder %s19_s16, 4   ;;  %s2511_s12 = smov %s1455_s13 }
 0x359   : > { %s2512_s13 = smov %s1549_s24  ;;  %s2513_s14 = smov %s1463_s15 }
 0x35a   : > { %s2514_s15 = smov %s2516_s18  ;;  %18 = sbr.rel (!%p16_p6) target bundleno = 8 (0x8), region = 83 }
 0x361   :  { %1051 = vsyncpa [#allocation7], 1 }
 0x362   :  { %1053 = vsyncpa [#allocation7 + $0x1], 1 }
 0x363   :  { %1054 = vsyncpa [#allocation8], 1 }
 0x364   :  { %1056 = vsyncpa [#allocation8 + $0x1], 1 }

</bundles_post_ra>
